<compile_context>
chip_gen: v6e
topology: v6e:2x2x1
jax: 0.10.0
libtpu: 0.0.40
codegen_flags: <defaults>
</compile_context>

<pallas_src>
import functools
import math

import jax
import jax.numpy as jnp
from jax.experimental import pallas as pl
from jax.experimental.pallas import tpu as pltpu


def _round_up(n, m):
    return ((n + m - 1) // m) * m


def _choose_tiling(batch, tile_m, n_rep):
    """Balanced 128-lane batch tiles; >=2 grid steps when batch allows (v7x)."""
    tile_m = max(128, _round_up(tile_m, 128))
    b128 = _round_up(max(batch, 1), 128)
    n_tiles = pl.cdiv(b128, tile_m)
    if b128 >= 256:
        n_tiles = max(n_tiles, 2)            # keep both v7x TensorCores busy
    tm = _round_up(pl.cdiv(b128, n_tiles), 128)   # balanced -> bounded padding
    n_tiles = pl.cdiv(b128, tm)
    # Largest packing factor <= n_rep that divides the lane tile (keeps the
    # packed slabs 128-lane aligned).
    n_rep_eff = max(1, n_rep)
    while n_rep_eff > 1 and (tm // 128) % n_rep_eff:
        n_rep_eff -= 1
    return tm, n_tiles, n_rep_eff


def _mlp_kernel(x_ref, w1_ref, b1_ref, w2p_ref, b2p_ref, w3t_ref, b3_ref,
                o_ref, *, n_rep):
    # Batch-on-lanes layout:
    #   x_ref  : (d_in, TM)                w1_ref : (H, d_in)     b1_ref: (H, 1)
    #   w2p_ref: (n_rep*H, n_rep*H) bf16   b2p_ref: (n_rep*H, 1)
    #   w3t_ref: (H, d_out)                b3_ref : (d_out, 1)
    #   o_ref  : (d_out, TM)
    d_in, tm = x_ref.shape
    hidden = w1_ref.shape[0]
    d_out = o_ref.shape[0]
    sub = tm // n_rep                       # lanes per packed slab (mult of 128)

    x = x_ref[...]                          # (d_in, TM) f32

    # ---- Layer 1 (K = d_in = 2): VPU broadcast-FMAs; f32 (runs on v5e VPU).
    h = b1_ref[...]                         # (H, 1) broadcasts over lanes
    for k in range(d_in):                   # tiny, static trip count
        h = h + w1_ref[:, k:k + 1] * x[k:k + 1, :]
    h = jnp.maximum(h, 0.0)                 # (H, TM) f32

    # Cast the streamed MXU operand once per tile (weights pre-cast in wrapper).
    hb = h.astype(w2p_ref.dtype)

    # Pack n_rep lane slabs along the contraction (sublane) axis so the
    # block-diagonal stationary computes them all in one MXU pass.
    if n_rep > 1:
        hp = jnp.concatenate(
            [hb[:, j * sub:(j + 1) * sub] for j in range(n_rep)], axis=0)
    else:
        hp = hb                             # (n_rep*H, sub)

    # ---- Layer 2: the only MXU matmul. bf16 operands, f32 accumulation.
    h2 = jnp.dot(w2p_ref[...], hp, preferred_element_type=jnp.float32)
    h2 = jnp.maximum(h2 + b2p_ref[...], 0.0)      # (n_rep*H, sub) f32

    # ---- Layer 3 (M = d_out = 2): VPU multiplies + cross-sublane reductions
    # per slab.  Keeping this off the MXU removes a full streaming pass that
    # was <1% utilized.
    w3t = w3t_ref[...]                      # (H, d_out) f32
    slabs = []
    for j in range(n_rep):
        blk = h2[j * hidden:(j + 1) * hidden, :]               # (H, sub)
        rows = [jnp.sum(w3t[:, d:d + 1] * blk, axis=0, keepdims=True)
                for d in range(d_out)]
        slabs.append(jnp.concatenate(rows, axis=0))            # (d_out, sub)
    out = jnp.concatenate(slabs, axis=1) + b3_ref[...]         # (d_out, TM)
    o_ref[...] = out.astype(o_ref.dtype)                       # lane-dense store


def angle_predictor_forward_lanes(xt, params, *, tile_m=1024, n_rep=4,
                                  compute_dtype=jnp.bfloat16):
    """Batch-on-lanes entry point: xt is (d_in, batch), returns (d_out, batch).

    Callers that can keep this layout end-to-end avoid the transpose copies of
    the PyTorch-shaped wrapper below.
    """
    w1, b1, w2, b2, w3, b3 = params
    d_in, batch = xt.shape
    hidden = w1.shape[0]
    d_out = w3.shape[0]

    tm, n_tiles, n_rep_eff = _choose_tiling(batch, tile_m, n_rep)
    b_pad = tm * n_tiles
    if b_pad != batch:
        xt = jnp.pad(xt, ((0, 0), (0, b_pad - batch)))

    # One-time (per call) weight prep: block-diagonal layer-2 stationary,
    # pre-cast to the MXU operand dtype; layer-3 weight transposed so its
    # columns are lane slices in-kernel.
    w2_packed = jnp.kron(jnp.eye(n_rep_eff, dtype=w2.dtype), w2).astype(compute_dtype)
    b2_packed = jnp.tile(b2, (n_rep_eff, 1))          # (n_rep*H, 1) f32
    w3t = w3.T                                        # (H, d_out) f32

    kernel = functools.partial(_mlp_kernel, n_rep=n_rep_eff)

    flops = 2 * b_pad * (d_in * hidden + hidden * hidden + hidden * d_out)
    bytes_accessed = (
        b_pad * (d_in + d_out) * 4
        + w2_packed.size * jnp.dtype(compute_dtype).itemsize
        + 4 * (hidden * d_in + hidden * n_rep_eff + d_out * hidden
               + hidden + d_out))

    out_t = pl.pallas_call(
        kernel,
        out_shape=jax.ShapeDtypeStruct((d_out, b_pad), jnp.float32),
        grid_spec=pltpu.PrefetchScalarGridSpec(
            num_scalar_prefetch=0,
            grid=(n_tiles,),
            in_specs=[
                # x tile marches along the batch (lane) axis ...
                pl.BlockSpec((d_in, tm), lambda i: (0, i)),
                # ... weights & biases are VMEM-resident (constant index_map).
                pl.BlockSpec((hidden, d_in), lambda i: (0, 0)),
                pl.BlockSpec((hidden, 1), lambda i: (0, 0)),
                pl.BlockSpec((n_rep_eff * hidden, n_rep_eff * hidden),
                             lambda i: (0, 0)),
                pl.BlockSpec((n_rep_eff * hidden, 1), lambda i: (0, 0)),
                pl.BlockSpec((hidden, d_out), lambda i: (0, 0)),
                pl.BlockSpec((d_out, 1), lambda i: (0, 0)),
            ],
            out_specs=pl.BlockSpec((d_out, tm), lambda i: (0, i)),
        ),
        compiler_params=pltpu.CompilerParams(
            dimension_semantics=("parallel",)),       # dual-TC sharding on v7x
        cost_estimate=pl.CostEstimate(
            flops=flops, bytes_accessed=bytes_accessed, transcendentals=0),
    )(xt, w1, b1, w2_packed, b2_packed, w3t, b3)

    return out_t[:, :batch]


def angle_predictor_forward(x, params, *, tile_m=1024, n_rep=4,
                            compute_dtype=jnp.bfloat16):
    """PyTorch-shaped forward: x (batch, ...) -> (batch, 2, 1).

    The transposes here are only the PyTorch-interface shim; use
    angle_predictor_forward_lanes() directly to keep the batch-on-lanes layout
    end-to-end and skip these copies.
    """
    batch = x.shape[0]
    x2 = x.reshape(batch, -1)                         # x.view(batch, -1)
    out_t = angle_predictor_forward_lanes(
        x2.T, params, tile_m=tile_m, n_rep=n_rep, compute_dtype=compute_dtype)
    d_out = out_t.shape[0]
    return out_t.T.reshape(batch, d_out, 1)           # output.view(batch, 2, 1)


def init_params(key, input_dim=2, hidden_dim=64, output_dim=2):
    """Deterministic init mirroring the PyTorch module (PyTorch weight layout).

    Layers 0 and 2: Linear default (uniform bound = 1/sqrt(fan_in)).
    Last layer: xavier_uniform_(gain=0.01) weights, zero bias.
    """
    k1, k2, k3, k4, k5 = jax.random.split(key, 5)

    def default_linear(kw, kb, fan_in, fan_out):
        bound = 1.0 / math.sqrt(fan_in)
        w = jax.random.uniform(kw, (fan_out, fan_in), jnp.float32, -bound, bound)
        b = jax.random.uniform(kb, (fan_out, 1), jnp.float32, -bound, bound)
        return w, b

    w1, b1 = default_linear(k1, k2, input_dim, hidden_dim)
    w2, b2 = default_linear(k3, k4, hidden_dim, hidden_dim)

    a = 0.01 * math.sqrt(6.0 / (hidden_dim + output_dim))
    w3 = jax.random.uniform(k5, (output_dim, hidden_dim), jnp.float32, -a, a)
    b3 = jnp.zeros((output_dim, 1), jnp.float32)
    return (w1, b1, w2, b2, w3, b3)


def reference_forward(x, params):
    """Pure-JAX reference for correctness checking."""
    w1, b1, w2, b2, w3, b3 = params
    batch = x.shape[0]
    x2 = x.reshape(batch, -1)
    h = jnp.maximum(x2 @ w1.T + b1.T, 0.0)
    h = jnp.maximum(h @ w2.T + b2.T, 0.0)
    o = h @ w3.T + b3.T
    return o.reshape(batch, -1, 1)


if __name__ == "__main__":
    key = jax.random.PRNGKey(0)
    k1, k2, k3, kp = jax.random.split(key, 4)
    params = init_params(kp)

    # Small batch: single 128-lane tile, n_rep_eff = 1, f32 path (exactness).
    x_small = jax.random.normal(k1, (8, 2), jnp.float32)
    out_s = jax.block_until_ready(
        angle_predictor_forward(x_small, params, compute_dtype=jnp.float32))
    ref_s = reference_forward(x_small, params)
    assert out_s.shape == (8, 2, 1), out_s.shape
    assert jnp.allclose(out_s, ref_s, atol=1e-4, rtol=1e-2), "f32 mismatch"

    # Ragged batch: 2 balanced tiles + padding, n_rep_eff = 2, bf16 default.
    x_mid = jax.random.normal(k2, (300, 2), jnp.float32)
    out_m = jax.block_until_ready(angle_predictor_forward(x_mid, params))
    ref_m = reference_forward(x_mid, params)
    assert out_m.shape == (300, 2, 1), out_m.shape
    assert jnp.allclose(out_m, ref_m, atol=2e-3, rtol=5e-2), "bf16 tiled mismatch"

    # 2 grid steps of 512 lanes, full n_rep_eff = 4 block-diag packing (bf16).
    x_big = jax.random.normal(k3, (1024, 2), jnp.float32)
    out_b = jax.block_until_ready(angle_predictor_forward(x_big, params))
    ref_b = reference_forward(x_big, params)
    assert out_b.shape == (1024, 2, 1), out_b.shape
    assert jnp.allclose(out_b, ref_b, atol=2e-3, rtol=5e-2), "bf16 packed mismatch"

    # Same shape, f32 compute for tight agreement with the reference.
    out_b32 = jax.block_until_ready(
        angle_predictor_forward(x_big, params, compute_dtype=jnp.float32))
    assert jnp.allclose(out_b32, ref_b, atol=1e-4, rtol=1e-2), "f32 packed mismatch"

    print("KERNEL_OK")
</pallas_src>

<mosaic_0001>
module attributes {stable_mosaic.version = 11 : i64} {
  func.func @_mlp_kernel(%arg0: i32, %arg1: memref<2x128xf32, #tpu.memory_space<vmem>>, %arg2: memref<64x2xf32, #tpu.memory_space<vmem>>, %arg3: memref<64x1xf32, #tpu.memory_space<vmem>>, %arg4: memref<64x64xf32, #tpu.memory_space<vmem>>, %arg5: memref<64x1xf32, #tpu.memory_space<vmem>>, %arg6: memref<64x2xf32, #tpu.memory_space<vmem>>, %arg7: memref<2x1xf32, #tpu.memory_space<vmem>>, %arg8: memref<2x128xf32, #tpu.memory_space<vmem>>) attributes {dimension_semantics = [#tpu.dimension_semantics<parallel>], iteration_bounds = array<i64: 1>, scalar_prefetch = 0 : i64, scratch_operands = 0 : i64, tpu.core_type = #tpu.core_type<tc>, window_params = [{transform_indices = @transform_0, window_bounds = array<i64: 2, 128>}, {pipeline_mode = #tpu.pipeline_mode<synchronous>, transform_indices = @transform_1, window_bounds = array<i64: 64, 2>}, {pipeline_mode = #tpu.pipeline_mode<synchronous>, transform_indices = @transform_2, window_bounds = array<i64: 64, 1>}, {pipeline_mode = #tpu.pipeline_mode<synchronous>, transform_indices = @transform_3, window_bounds = array<i64: 64, 64>}, {pipeline_mode = #tpu.pipeline_mode<synchronous>, transform_indices = @transform_4, window_bounds = array<i64: 64, 1>}, {pipeline_mode = #tpu.pipeline_mode<synchronous>, transform_indices = @transform_5, window_bounds = array<i64: 64, 2>}, {pipeline_mode = #tpu.pipeline_mode<synchronous>, transform_indices = @transform_6, window_bounds = array<i64: 2, 1>}, {transform_indices = @transform_7, window_bounds = array<i64: 2, 128>}]} {
    %c0 = arith.constant 0 : index
    %c0_0 = arith.constant 0 : index
    %0 = vector.load %arg1[%c0, %c0_0] : memref<2x128xf32, #tpu.memory_space<vmem>>, vector<2x128xf32>
    %c0_1 = arith.constant 0 : index
    %c0_2 = arith.constant 0 : index
    %1 = vector.load %arg3[%c0_1, %c0_2] : memref<64x1xf32, #tpu.memory_space<vmem>>, vector<64x1xf32>
    %c0_3 = arith.constant 0 : index
    %c0_4 = arith.constant 0 : index
    %2 = vector.load %arg2[%c0_3, %c0_4] : memref<64x2xf32, #tpu.memory_space<vmem>>, vector<64x1xf32>
    %3 = vector.extract_strided_slice %0 {offsets = [0, 0], sizes = [1, 128], strides = [1, 1]} : vector<2x128xf32> to vector<1x128xf32>
    %4 = vector.broadcast %2 : vector<64x1xf32> to vector<64x128xf32>
    %5 = vector.broadcast %3 : vector<1x128xf32> to vector<64x128xf32>
    %6 = arith.mulf %4, %5 : vector<64x128xf32>
    %7 = vector.broadcast %1 : vector<64x1xf32> to vector<64x128xf32>
    %8 = arith.addf %7, %6 : vector<64x128xf32>
    %c0_5 = arith.constant 0 : index
    %c1 = arith.constant 1 : index
    %9 = vector.load %arg2[%c0_5, %c1] : memref<64x2xf32, #tpu.memory_space<vmem>>, vector<64x1xf32>
    %10 = vector.extract_strided_slice %0 {offsets = [1, 0], sizes = [1, 128], strides = [1, 1]} : vector<2x128xf32> to vector<1x128xf32>
    %11 = vector.broadcast %9 : vector<64x1xf32> to vector<64x128xf32>
    %12 = vector.broadcast %10 : vector<1x128xf32> to vector<64x128xf32>
    %13 = arith.mulf %11, %12 : vector<64x128xf32>
    %14 = arith.addf %8, %13 : vector<64x128xf32>
    %cst = arith.constant 0.000000e+00 : f32
    %15 = vector.broadcast %cst : f32 to vector<64x128xf32>
    %16 = arith.maximumf %14, %15 : vector<64x128xf32>
    %c0_6 = arith.constant 0 : index
    %c0_7 = arith.constant 0 : index
    %17 = vector.load %arg4[%c0_6, %c0_7] : memref<64x64xf32, #tpu.memory_space<vmem>>, vector<64x64xf32>
    %cst_8 = arith.constant dense<0.000000e+00> : vector<64x128xf32>
    %18 = tpu.matmul %17, %16, %cst_8 {dimension_numbers = #tpu.dot_dimension_numbers<[1], [0], [0], [1], [0, 0, 1, 1], [], []>} : vector<64x64xf32>, vector<64x128xf32>, vector<64x128xf32> -> vector<64x128xf32>
    %c0_9 = arith.constant 0 : index
    %c0_10 = arith.constant 0 : index
    %19 = vector.load %arg5[%c0_9, %c0_10] : memref<64x1xf32, #tpu.memory_space<vmem>>, vector<64x1xf32>
    %20 = vector.broadcast %19 : vector<64x1xf32> to vector<64x128xf32>
    %21 = arith.addf %18, %20 : vector<64x128xf32>
    %cst_11 = arith.constant 0.000000e+00 : f32
    %22 = vector.broadcast %cst_11 : f32 to vector<64x128xf32>
    %23 = arith.maximumf %21, %22 : vector<64x128xf32>
    %c0_12 = arith.constant 0 : index
    %c0_13 = arith.constant 0 : index
    %24 = vector.load %arg6[%c0_12, %c0_13] : memref<64x2xf32, #tpu.memory_space<vmem>>, vector<64x2xf32>
    %25 = vector.extract_strided_slice %24 {offsets = [0, 0], sizes = [64, 1], strides = [1, 1]} : vector<64x2xf32> to vector<64x1xf32>
    %26 = vector.broadcast %25 : vector<64x1xf32> to vector<64x128xf32>
    %27 = arith.mulf %26, %23 : vector<64x128xf32>
    %cst_14 = arith.constant dense<0.000000e+00> : vector<128xf32>
    %28 = vector.multi_reduction <add>, %27, %cst_14 [0] : vector<64x128xf32> to vector<128xf32>
    %29 = vector.shape_cast %28 : vector<128xf32> to vector<1x128xf32>
    %30 = vector.extract_strided_slice %24 {offsets = [0, 1], sizes = [64, 1], strides = [1, 1]} : vector<64x2xf32> to vector<64x1xf32>
    %31 = vector.broadcast %30 : vector<64x1xf32> to vector<64x128xf32>
    %32 = arith.mulf %31, %23 : vector<64x128xf32>
    %cst_15 = arith.constant dense<0.000000e+00> : vector<128xf32>
    %33 = vector.multi_reduction <add>, %32, %cst_15 [0] : vector<64x128xf32> to vector<128xf32>
    %34 = vector.shape_cast %33 : vector<128xf32> to vector<1x128xf32>
    %35 = tpu.concatenate %29, %34 in 0 : vector<1x128xf32>, vector<1x128xf32> -> vector<2x128xf32>
    %c0_16 = arith.constant 0 : index
    %c0_17 = arith.constant 0 : index
    %36 = vector.load %arg7[%c0_16, %c0_17] : memref<2x1xf32, #tpu.memory_space<vmem>>, vector<2x1xf32>
    %37 = vector.broadcast %36 : vector<2x1xf32> to vector<2x128xf32>
    %38 = arith.addf %35, %37 : vector<2x128xf32>
    %c0_18 = arith.constant 0 : index
    %c0_19 = arith.constant 0 : index
    %39 = vector.load %arg8[%c0_18, %c0_19] : memref<2x128xf32, #tpu.memory_space<vmem>>, vector<2x128xf32>
    tpu.vector_store %arg8[%c0_18, %c0_19], %38 {strides = array<i32>} : memref<2x128xf32, #tpu.memory_space<vmem>>, vector<2x128xf32>,
    return
  }
  func.func @transform_0(%arg0: i32) -> (i32, i32) {
    %c0_i32 = arith.constant 0 : i32
    %c0_i32_0 = arith.constant 0 : i32
    return %c0_i32, %arg0 : i32, i32
  }
  func.func @transform_1(%arg0: i32) -> (i32, i32) {
    %c0_i32 = arith.constant 0 : i32
    %c0_i32_0 = arith.constant 0 : i32
    %c0_i32_1 = arith.constant 0 : i32
    return %c0_i32, %c0_i32_0 : i32, i32
  }
  func.func @transform_2(%arg0: i32) -> (i32, i32) {
    %c0_i32 = arith.constant 0 : i32
    %c0_i32_0 = arith.constant 0 : i32
    %c0_i32_1 = arith.constant 0 : i32
    return %c0_i32, %c0_i32_0 : i32, i32
  }
  func.func @transform_3(%arg0: i32) -> (i32, i32) {
    %c0_i32 = arith.constant 0 : i32
    %c0_i32_0 = arith.constant 0 : i32
    %c0_i32_1 = arith.constant 0 : i32
    return %c0_i32, %c0_i32_0 : i32, i32
  }
  func.func @transform_4(%arg0: i32) -> (i32, i32) {
    %c0_i32 = arith.constant 0 : i32
    %c0_i32_0 = arith.constant 0 : i32
    %c0_i32_1 = arith.constant 0 : i32
    return %c0_i32, %c0_i32_0 : i32, i32
  }
  func.func @transform_5(%arg0: i32) -> (i32, i32) {
    %c0_i32 = arith.constant 0 : i32
    %c0_i32_0 = arith.constant 0 : i32
    %c0_i32_1 = arith.constant 0 : i32
    return %c0_i32, %c0_i32_0 : i32, i32
  }
  func.func @transform_6(%arg0: i32) -> (i32, i32) {
    %c0_i32 = arith.constant 0 : i32
    %c0_i32_0 = arith.constant 0 : i32
    %c0_i32_1 = arith.constant 0 : i32
    return %c0_i32, %c0_i32_0 : i32, i32
  }
  func.func @transform_7(%arg0: i32) -> (i32, i32) {
    %c0_i32 = arith.constant 0 : i32
    %c0_i32_0 = arith.constant 0 : i32
    return %c0_i32, %arg0 : i32, i32
  }
}

</mosaic_0001>

<bundles_post_ra>
// kernel: tpu_custom_call.1
= control target key start
LH: loop header
LB: loop body
LE: loop exit
PB: predicated region body
PF: predicated region fallthrough
CT: control target
= control target key end

     0   :  { %v655_v2 = vmov 0   ;;  %v656_v4 = vmov 1   ;;  %s873_s0 = inlined_call_operand.vmem [shape: f32[2,128], index: 0, kind: input, shape index: {}]   ;;  %s874_s1 = inlined_call_operand.vmem [shape: f32[64,2], index: 1, kind: input, shape index: {}]   ;;  %s875_s2 = inlined_call_operand.vmem [shape: f32[64,1], index: 2, kind: input, shape index: {}]   ;;  %s876_s3 = inlined_call_operand.vmem [shape: f32[64,64], index: 3, kind: input, shape index: {}]   ;;  %s877_s4 = inlined_call_operand.vmem [shape: f32[64,1], index: 4, kind: input, shape index: {}]   ;;  %s878_s5 = inlined_call_operand.vmem [shape: f32[64,2], index: 5, kind: input, shape index: {}]   ;;  %s879_s6 = inlined_call_operand.vmem [shape: f32[2,1], index: 6, kind: input, shape index: {}]   ;;  %s880_s7 = inlined_call_operand.hbm [shape: f32[2,128], index: 7, kind: output, shape index: {}]  }
   0x1   :  { %v43_v0 = vld [vmem:[%s874_s1 + $0x38] sm:$0xff]  ;;  %616 = vset.pattern.permute.xlu1 %v655_v2  ;;  %615 = vset.pattern.permute.xlu0 %v655_v2  ;;  %v42_v3 = vld [vmem:[%s874_s1 + $0x30] sm:$0xff]  ;;  %v41_v5 = vld [vmem:[%s874_s1 + $0x28] sm:$0xff] }
   0x2   :  { %v35_v1 = vld [vmem:[%s875_s2 + $0x38] sm:$0xff]  ;;  %81 = vperm.xlu0 %615, %v43_v0  }
   0x3   :  { %133 = vperm.xlu1 %616, %v35_v1  }
   0x6   :  { %76 = vperm.xlu0 %615, %v42_v3  }
   0x7   :  { %617 = vset.pattern.permute.xlu1 %v656_v4 }
   0x8   :  { %173 = vperm.xlu1 %617, %v43_v0  }
   0x9   :  { %12 = vsyncpa [#allocation3], 0  ;;  %v34_v6 = vld [vmem:[%s875_s2 + $0x30] sm:$0xff]  ;;  %v32_v7 = vld [vmem:[%s875_s2 + $0x20] sm:$0xff]  ;;  %vm260_vm0 = vcmask 523264   ;;  %v84_v36 = vlaneseq  ;;  %vm520_vm1 = vcmask 1040384  }
   0xa   :  { %71 = vperm.xlu0 %615, %v41_v5   ;;  %v40_v8 = vld [vmem:[%s874_s1 + $0x20] sm:$0xff]  ;;  %v31_v9 = vld [vmem:[%s875_s2 + $0x18] sm:$0xff]  ;;  %v33_v10 = vld [vmem:[%s875_s2 + $0x28] sm:$0xff] }
   0xb   :  { %v37_v11 = vld [vmem:[%s874_s1 + $0x8] sm:$0xff]  ;;  %v39_v12 = vld [vmem:[%s874_s1 + $0x18] sm:$0xff]  ;;  %v38_v13 = vld [vmem:[%s874_s1 + $0x10] sm:$0xff]  ;;  %v85_v37 = vshrl.u32 %v84_v36, 7 }
   0xc   :  { %618 = vset.pattern.permute.xlu1 %v655_v2  ;;  %v36_v14 = vld [vmem:[%s874_s1] sm:$0xff]  ;;  %v30_v15 = vld [vmem:[%s875_s2 + $0x10] sm:$0xff]  ;;  %v29_v16 = vld [vmem:[%s875_s2 + $0x8] sm:$0xff] }
   0xd   :  { %128 = vperm.xlu1 %618, %v34_v6   ;;  %v28_v17 = vld [vmem:[%s875_s2] sm:$0xff]  ;;  %v214_v21 = vld [vmem:[%s877_s4 + $0x10] sm:$0xff]  ;;  %v215_v22 = vld [vmem:[%s877_s4 + $0x18] sm:$0xff]  ;;  %v86_v38 = vsub.s32 0, %v85_v37  ;;  %v178_v42 = vsub.s32 1, %v85_v37 }
   0xe   :  { %118 = vperm.xlu0 %615, %v32_v7   ;;  %v212_v18 = vld [vmem:[%s877_s4] sm:$0xff]  ;;  %v213_v23 = vld [vmem:[%s877_s4 + $0x8] sm:$0xff]  ;;  %v400_v26 = vld [vmem:[%s878_s5 + $0x10] sm:$0xff] }
   0xf   :  { %v204_v19 = vld [vmem:[%s876_s3] sm:$0xff]  ;;  %v399_v24 = vld [vmem:[%s878_s5 + $0x8] sm:$0xff]  ;;  %v401_v27 = vld [vmem:[%s878_s5 + $0x18] sm:$0xff] }
  0x10   :  { %v208_v20 = vld [vmem:[%s876_s3 + $0x20] sm:$0xff]  ;;  %584 = vmatprep.mubr.msk.f32.mxu0 %vm260_vm0, %v204_v19  ;;  %v218_v29 = vld [vmem:[%s877_s4 + $0x30] sm:$0xff]  ;;  %v217_v30 = vld [vmem:[%s877_s4 + $0x28] sm:$0xff] }
  0x11   :  { %66 = vperm.xlu1 %618, %v40_v8   ;;  %590 = vmatprep.mubr.msk.f32.mxu1 %vm260_vm0, %v208_v20  ;;  %v398_v25 = vld [vmem:[%s878_s5] sm:$0xff]  ;;  %v403_v32 = vld [vmem:[%s878_s5 + $0x28] sm:$0xff]  ;;  %v404_v33 = vld [vmem:[%s878_s5 + $0x30] sm:$0xff] }
  0x12   :  { %113 = vperm.xlu0 %615, %v31_v9   ;;  %v216_v28 = vld [vmem:[%s877_s4 + $0x20] sm:$0xff]  ;;  %v219_v34 = vld [vmem:[%s877_s4 + $0x38] sm:$0xff] }
  0x13   :  { %v402_v31 = vld [vmem:[%s878_s5 + $0x20] sm:$0xff]  ;;  %v405_v35 = vld [vmem:[%s878_s5 + $0x38] sm:$0xff] }
  0x14   :  { %v522_v39 = vld [vmem:[%s879_s6] sm:$0x3] }
  0x15   :  { %123 = vperm.xlu1 %618, %v33_v10   ;;  %v27_v40 = vld [vmem:[%s873_s0] sm:$0x3] }
  0x16   :  { %51 = vperm.xlu0 %615, %v37_v11   ;;  %v826_v41 = vrot.slane %v27_v40, %v86_v38  ;;  %v829_v46 = vrot.slane %v27_v40, %v178_v42 }
  0x19   :  { %61 = vperm.xlu1 %618, %v39_v12  }
  0x1a   :  { %622 = vset.pattern.permute.xlu0 %v656_v4 }
  0x1b   :  { %169 = vperm.xlu0 %622, %v42_v3  }
  0x1d   :  { %619 = vset.pattern.permute.xlu1 %v656_v4 }
  0x1e   :  { %161 = vperm.xlu1 %619, %v40_v8  }
  0x1f   :  { %165 = vperm.xlu0 %622, %v41_v5  }
  0x22   :  { %620 = vset.pattern.permute.xlu1 %v655_v2 }
  0x23   :  { %56 = vperm.xlu1 %620, %v38_v13   ;;  %153 = vperm.xlu0 %622, %v38_v13  }
  0x27   :  { %621 = vset.pattern.permute.xlu1 %v656_v4  ;;  %149 = vperm.xlu0 %622, %v37_v11  }
  0x28   :  { %157 = vperm.xlu1 %621, %v39_v12  }
  0x2b   :  { %145 = vperm.xlu0 %622, %v36_v14  }
  0x2c   :  { %623 = vset.pattern.permute.xlu1 %v655_v2 }
  0x2d   :  { %108 = vperm.xlu1 %623, %v30_v15  }
  0x2f   :  { %624 = vset.pattern.permute.xlu0 %v655_v2 }
  0x30   :  { %227 = vperm.xlu0 %624, %v213_v23  }
  0x31   :  { %46 = vperm.xlu1 %623, %v36_v14  }
  0x34   :  { %408 = vperm.xlu0 %624, %v398_v25  }
  0x35   :  { %103 = vperm.xlu1 %623, %v29_v16  }
  0x38   :  { %418 = vperm.xlu0 %624, %v400_v26  }
  0x39   :  { %98 = vperm.xlu1 %623, %v28_v17  }
  0x3c   :  { %423 = vperm.xlu0 %624, %v401_v27  }
  0x3d   :  { %222 = vperm.xlu1 %623, %v212_v18  }
  0x40   :  { %252 = vperm.xlu0 %624, %v218_v29  }
  0x41   :  { %232 = vperm.xlu1 %623, %v214_v21  }
  0x44   :  { %630 = vset.pattern.permute.xlu0 %v656_v4 }
  0x45   :  { %237 = vperm.xlu1 %623, %v215_v22   ;;  %468 = vperm.xlu0 %630, %v398_v25  }
  0x49   :  { %413 = vperm.xlu1 %623, %v399_v24   ;;  %484 = vperm.xlu0 %630, %v402_v31  }
  0x4d   :  { %625 = vset.pattern.permute.xlu1 %v656_v4  ;;  %488 = vperm.xlu0 %630, %v403_v32  }
  0x4e   :  { %472 = vperm.xlu1 %625, %v399_v24  }
  0x51   :  { %492 = vperm.xlu0 %630, %v404_v33  }
  0x52   :  { %626 = vset.pattern.permute.xlu1 %v655_v2 }
  0x53   :  { %242 = vperm.xlu1 %626, %v216_v28  }
  0x55   :  { %496 = vperm.xlu0 %630, %v405_v35  }
  0x57   :  { %627 = vset.pattern.permute.xlu1 %v656_v4 }
  0x58   :  { %476 = vperm.xlu1 %627, %v400_v26  }
  0x59   :  { %632 = vset.pattern.permute.xlu0 %v655_v2 }
  0x5c   :  { %628 = vset.pattern.permute.xlu1 %v655_v2 }
  0x5d   :  { %247 = vperm.xlu1 %628, %v217_v30  }
  0x61   :  { %629 = vset.pattern.permute.xlu1 %v656_v4 }
  0x62   :  { %480 = vperm.xlu1 %629, %v401_v27  }
  0x66   :  { %631 = vset.pattern.permute.xlu1 %v655_v2 }
  0x67   :  { %428 = vperm.xlu1 %631, %v402_v31  }
  0x6b   :  { %257 = vperm.xlu1 %631, %v219_v34  }
  0x6f   :  { %433 = vperm.xlu1 %631, %v403_v32  }
  0x73   :  { %438 = vperm.xlu1 %631, %v404_v33  }
  0x77   :  { %443 = vperm.xlu1 %631, %v405_v35  }
  0x7b   :  { %525 = vperm.xlu1 %631, %v522_v39  }
  0x7d   :  { %v82_v43 = vpop.permute.xlu0 %81 }
  0x7e   :  { %v134_v44 = vpop.permute.xlu1 %133  ;;  %v95_v45 = vmul.f32 %v826_v41, %v82_v43 }
  0x80   :  { %v143_v49 = vadd.f32 %v134_v44, %v95_v45  ;;  %v205_v45 = vld [vmem:[%s876_s3 + $0x8] sm:$0xff] }
  0x81   :  { %v77_v47 = vpop.permute.xlu0 %76 }
  0x82   :  { %v94_v60 = vmul.f32 %v826_v41, %v77_v47  ;;  %v210_v47 = vld [vmem:[%s876_s3 + $0x30] sm:$0xff] }
  0x83   :  { %v174_v48 = vpop.permute.xlu1 %173 }
  0x84   :  { %v187_v50 = vmul.f32 %v829_v46, %v174_v48  ;;  %v207_v48 = vld [vmem:[%s876_s3 + $0x18] sm:$0xff] }
  0x85   :  { %v72_v52 = vpop.permute.xlu0 %71 }
  0x86   :  { %v195_v51 = vadd.f32 %v187_v50, %v143_v49  ;;  %v93_v3 = vmul.f32 %v826_v41, %v72_v52  ;;  %v211_v49 = vld [vmem:[%s876_s3 + $0x38] sm:$0xff] }
  0x88   :  { %v203_v53 = vmax.f32 %v195_v51, 0.0  ;;  %v129_v54 = vpop.permute.xlu1 %128 }
  0x89   :  { %v119_v55 = vpop.permute.xlu0 %118  ;;  %v142_v63 = vadd.f32 %v129_v54, %v94_v60 }
  0x8a   :  { %568 = vmatprep.subr.mxu0 %v203_v53  ;;  %596 = vmatprep.subr.mxu1 %v203_v53 }
  0x8b   :  { %569 = vmatpush3.msra.mxu0 %v203_v53  ;;  %604 = vmatpush3.msra.mxu1 %v203_v53 }
  0x8c   :  { %v67_v56 = vpop.permute.xlu1 %66 }
  0x8d   :  { %v114_v57 = vpop.permute.xlu0 %113  ;;  %v92_v0 = vmul.f32 %v826_v41, %v67_v56 }
  0x8f   :  { %v140_v7 = vadd.f32 %v119_v55, %v92_v0 }
  0x90   :  { %v124_v58 = vpop.permute.xlu1 %123 }
  0x91   :  { %v52_v59 = vpop.permute.xlu0 %51  ;;  %v141_v8 = vadd.f32 %v124_v58, %v93_v3 }
  0x92   :  { %v89_v31 = vmul.f32 %v826_v41, %v52_v59 }
  0x94   :  { %v62_v61 = vpop.permute.xlu1 %61 }
  0x95   :  { %v91_v14 = vmul.f32 %v826_v41, %v62_v61 }
  0x96   :  { %v170_v62 = vpop.permute.xlu0 %169 }
  0x97   :  { %v186_v1 = vmul.f32 %v829_v46, %v170_v62  ;;  %v139_v18 = vadd.f32 %v114_v57, %v91_v14 }
  0x99   :  { %v162_v2 = vpop.permute.xlu1 %161  ;;  %v194_v4 = vadd.f32 %v186_v1, %v142_v63 }
  0x9a   :  { %v184_v5 = vmul.f32 %v829_v46, %v162_v2  ;;  %v166_v6 = vpop.permute.xlu0 %165 }
  0x9b   :  { %v202_v9 = vmax.f32 %v194_v4, 0.0  ;;  %v185_v10 = vmul.f32 %v829_v46, %v166_v6 }
  0x9c   :  { %v192_v11 = vadd.f32 %v184_v5, %v140_v7 }
  0x9d   :  { %v193_v12 = vadd.f32 %v185_v10, %v141_v8  ;;  %570 = vmatprep.subr.mxu0 %v202_v9  ;;  %597 = vmatprep.subr.mxu1 %v202_v9 }
  0x9e   :  { %v57_v13 = vpop.permute.xlu1 %56  ;;  %571 = vmatpush3.msra.mxu0 %v202_v9  ;;  %605 = vmatpush3.msra.mxu1 %v202_v9  ;;  %v200_v16 = vmax.f32 %v192_v11, 0.0  ;;  %v154_v20 = vpop.permute.xlu0 %153 }
  0x9f   :  { %v201_v15 = vmax.f32 %v193_v12, 0.0  ;;  %v90_v22 = vmul.f32 %v826_v41, %v57_v13  ;;  %v182_v25 = vmul.f32 %v829_v46, %v154_v20 }
  0xa1   :  { %572 = vmatprep.subr.mxu0 %v201_v15  ;;  %598 = vmatprep.subr.mxu1 %v201_v15 }
  0xa2   :  { %573 = vmatpush3.msra.mxu0 %v201_v15  ;;  %606 = vmatpush3.msra.mxu1 %v201_v15  ;;  %v150_v28 = vpop.permute.xlu0 %149 }
  0xa3   :  { %v158_v17 = vpop.permute.xlu1 %157  ;;  %574 = vmatprep.subr.mxu0 %v200_v16  ;;  %599 = vmatprep.subr.mxu1 %v200_v16  ;;  %v181_v33 = vmul.f32 %v829_v46, %v150_v28 }
  0xa4   :  { %v183_v19 = vmul.f32 %v829_v46, %v158_v17  ;;  %575 = vmatpush3.msra.mxu0 %v200_v16  ;;  %607 = vmatpush3.msra.mxu1 %v200_v16 }
  0xa6   :  { %v191_v21 = vadd.f32 %v183_v19, %v139_v18  ;;  %v146_v35 = vpop.permute.xlu0 %145 }
  0xa7   :  { %v180_v39 = vmul.f32 %v829_v46, %v146_v35  ;;  %v206_v46 = vld [vmem:[%s876_s3 + $0x10] sm:$0xff] }
  0xa8   :  { %v199_v23 = vmax.f32 %v191_v21, 0.0  ;;  %v109_v24 = vpop.permute.xlu1 %108 }
  0xa9   :  { %v138_v26 = vadd.f32 %v109_v24, %v90_v22 }
  0xaa   :  { %576 = vmatprep.subr.mxu0 %v199_v23  ;;  %600 = vmatprep.subr.mxu1 %v199_v23 }
  0xab   :  { %v190_v27 = vadd.f32 %v182_v25, %v138_v26  ;;  %577 = vmatpush3.msra.mxu0 %v199_v23  ;;  %608 = vmatpush3.msra.mxu1 %v199_v23  ;;  %v228_v55 = vpop.permute.xlu0 %227 }
  0xac   :  { %v47_v29 = vpop.permute.xlu1 %46 }
  0xad   :  { %v198_v30 = vmax.f32 %v190_v27, 0.0  ;;  %v88_v36 = vmul.f32 %v826_v41, %v47_v29  ;;  %v209_v41 = vld [vmem:[%s876_s3 + $0x28] sm:$0xff]  ;;  %s657_s3 = smov [#allocation2]  }
  0xae   :  { %s536_s8 = sshll.u32 %s657_s3, 4  ;;  %s537_s8 = int_to_ptr.vmem [resolvable:$true] %s536_s8 }
  0xaf   :  { %578 = vmatprep.subr.mxu0 %v198_v30  ;;  %601 = vmatprep.subr.mxu1 %v198_v30  ;;  %v409_v57 = vpop.permute.xlu0 %408  ;;  %s633_s9 = scalar_lea.vmem %s537_s8, 32  ;;  %p638_p1 = scmp.lt.s32.totalorder %s537_s8, %s537_s8 }
  0xb0   :  { %v104_v32 = vpop.permute.xlu1 %103  ;;  %579 = vmatpush3.msra.mxu0 %v198_v30  ;;  %609 = vmatpush3.msra.mxu1 %v198_v30  ;;  %p634_p0 = scmp.ne.s32.totalorder %s537_s8, %s633_s9  ;;  %p639_p2 = scmp.lt.s32.totalorder %s633_s9, %s633_s9 }
  0xb1   :  { %v137_v34 = vadd.f32 %v104_v32, %v89_v31 }
  0xb2   :  { %p640_p3 = por %p639_p2, %p638_p1 }
  0xb3   :  { %v189_v37 = vadd.f32 %v181_v33, %v137_v34  ;;  %v419_v59 = vpop.permute.xlu0 %418 }
  0xb4   :  { %v99_v38 = vpop.permute.xlu1 %98  ;;  %p641_p4 = pnand %p640_p3, %p634_p0 }
  0xb5   :  { %v197_v40 = vmax.f32 %v189_v37, 0.0  ;;  %v136_v42 = vadd.f32 %v99_v38, %v88_v36 }
  0xb7   :  { %v188_v43 = vadd.f32 %v180_v39, %v136_v42  ;;  %580 = vmatprep.subr.mxu0 %v197_v40  ;;  %602 = vmatprep.subr.mxu1 %v197_v40  ;;  %v424_v61 = vpop.permute.xlu0 %423 }
  0xb8   :  { %581 = vmatpush3.msra.mxu0 %v197_v40  ;;  %610 = vmatpush3.msra.mxu1 %v197_v40  ;;  %v223_v50 = vpop.permute.xlu1 %222 }
  0xb9   :  { %v196_v44 = vmax.f32 %v188_v43, 0.0 }
  0xbb   :  { %582 = vmatprep.subr.mxu0 %v196_v44  ;;  %603 = vmatprep.subr.mxu1 %v196_v44  ;;  %v253_v63 = vpop.permute.xlu0 %252 }
  0xbc   :  { %583 = vmatpush3.msra.mxu0 %v196_v44  ;;  %611 = vmatpush3.msra.mxu1 %v196_v44  ;;  %v233_v51 = vpop.permute.xlu1 %232 }
  0xbd   :  { %585 = vmatmul.mubr.msk.f32.vlgmr.msra.gmra.mxu0 %vm260_vm0, %v205_v45  ;;  %591 = vmatmul.mubr.msk.f32.vlgmr.msra.gmra.mxu1 %vm260_vm0, %v209_v41 }
  0xbe   :  { %587 = vmatprep.mubr.msk.f32.mxu0 %vm260_vm0, %v206_v46  ;;  %593 = vmatprep.mubr.msk.f32.mxu1 %vm260_vm0, %v210_v47 }
  0xc0   :  { %v238_v52 = vpop.permute.xlu1 %237  ;;  %v469_v1 = vpop.permute.xlu0 %468 }
  0xc1   :  { %588 = vmatmul.mubr.msk.f32.gmra.mxu0 %vm260_vm0, %v207_v48  ;;  %594 = vmatmul.mubr.msk.f32.gmra.mxu1 %vm260_vm0, %v211_v49 }
  0xc4   :  { %v414_v53 = vpop.permute.xlu1 %413  ;;  %v485_v8 = vpop.permute.xlu0 %484 }
  0xc8   :  { %v489_v22 = vpop.permute.xlu0 %488 }
  0xc9   :  { %v473_v54 = vpop.permute.xlu1 %472 }
  0xcc   :  { %v493_v42 = vpop.permute.xlu0 %492 }
  0xce   :  { %v243_v56 = vpop.permute.xlu1 %242 }
  0xd3   :  { %v477_v58 = vpop.permute.xlu1 %476 }
  0xd8   :  { %v248_v60 = vpop.permute.xlu1 %247 }
  0xdd   :  { %v481_v62 = vpop.permute.xlu1 %480 }
  0xe2   :  { %v429_v0 = vpop.permute.xlu1 %428 }
  0xe6   :  { %v258_v7 = vpop.permute.xlu1 %257 }
  0xea   :  { %v434_v21 = vpop.permute.xlu1 %433 }
  0xee   :  { %v439_v40 = vpop.permute.xlu1 %438 }
 0x17d   :  { %v586_v2 = vpop.f32.mrf.mxu0  ;;  %v592_v3 = vpop.f32.mrf.mxu1 }
 0x17e   :  { %v357_v4 = vadd.f32 %v586_v2, %v228_v55  ;;  %v377_v23 = vadd.f32 %v592_v3, %v248_v60 }
 0x17f   :  { %v351_v5 = vpop.f32.mrf.mxu0  ;;  %v371_v6 = vpop.f32.mrf.mxu1 }
 0x180   :  { %v352_v9 = vadd.f32 %v351_v5, %v223_v50  ;;  %v391_v12 = vmax.f32 %v357_v4, 0.0  ;;  %v372_v16 = vadd.f32 %v371_v6, %v243_v56  ;;  %v395_v34 = vmax.f32 %v377_v23, 0.0  ;;  %v444_v56 = vpop.permute.xlu1 %443 }
 0x181   :  { %v589_v10 = vpop.f32.mrf.mxu0  ;;  %v595_v11 = vpop.f32.mrf.mxu1 }
 0x182   :  { %v390_v13 = vmax.f32 %v352_v9, 0.0  ;;  %v367_v14 = vadd.f32 %v589_v10, %v238_v52  ;;  %v447_v25 = vmul.f32 %v414_v53, %v391_v12  ;;  %v500_v26 = vmul.f32 %v473_v54, %v391_v12 }
 0x183   :  { %v361_v15 = vpop.f32.mrf.mxu0  ;;  %v381_v20 = vpop.f32.mrf.mxu1  ;;  %v394_v28 = vmax.f32 %v372_v16, 0.0  ;;  %v387_v35 = vadd.f32 %v595_v11, %v258_v7  ;;  %v451_v47 = vmul.f32 %v434_v21, %v395_v34  ;;  %v504_v48 = vmul.f32 %v489_v22, %v395_v34 }
 0x184   :  { %v362_v17 = vadd.f32 %v361_v15, %v233_v51  ;;  %v446_v18 = vmul.f32 %v409_v57, %v390_v13  ;;  %v499_v19 = vmul.f32 %v469_v1, %v390_v13  ;;  %v393_v27 = vmax.f32 %v367_v14, 0.0  ;;  %v497_v57 = vpop.permute.xlu0 %496  ;;  %v526_v12 = vpop.permute.xlu1 %525 }
 0x185   :  { %v382_v29 = vadd.f32 %v381_v20, %v253_v63  ;;  %v450_v43 = vmul.f32 %v429_v0, %v394_v28  ;;  %v503_v44 = vmul.f32 %v485_v8, %v394_v28  ;;  %v397_v49 = vmax.f32 %v387_v35, 0.0 }
 0x186   :  { %v392_v24 = vmax.f32 %v362_v17, 0.0  ;;  %v454_v30 = vadd.f32 %v447_v25, %v446_v18  ;;  %v507_v31 = vadd.f32 %v500_v26, %v499_v19  ;;  %v449_v36 = vmul.f32 %v424_v61, %v393_v27 }
 0x187   :  { %v502_v37 = vmul.f32 %v481_v62, %v393_v27  ;;  %v396_v46 = vmax.f32 %v382_v29, 0.0 }
 0x188   :  { %v448_v32 = vmul.f32 %v419_v59, %v392_v24  ;;  %v501_v33 = vmul.f32 %v477_v58, %v392_v24  ;;  %v453_v58 = vmul.f32 %v444_v56, %v397_v49  ;;  %v506_v59 = vmul.f32 %v497_v57, %v397_v49 }
 0x189   :  { %v452_v52 = vmul.f32 %v439_v40, %v396_v46  ;;  %v505_v54 = vmul.f32 %v493_v42, %v396_v46 }
 0x18a   :  { %v455_v38 = vadd.f32 %v454_v30, %v448_v32  ;;  %v508_v39 = vadd.f32 %v507_v31, %v501_v33 }
 0x18c   :  { %v456_v45 = vadd.f32 %v455_v38, %v449_v36  ;;  %v509_v41 = vadd.f32 %v508_v39, %v502_v37 }
 0x18e   :  { %v457_v50 = vadd.f32 %v456_v45, %v450_v43  ;;  %v510_v51 = vadd.f32 %v509_v41, %v503_v44 }
 0x190   :  { %v458_v53 = vadd.f32 %v457_v50, %v451_v47  ;;  %v511_v55 = vadd.f32 %v510_v51, %v504_v48 }
 0x192   :  { %v459_v60 = vadd.f32 %v458_v53, %v452_v52  ;;  %v512_v61 = vadd.f32 %v511_v55, %v505_v54 }
 0x194   :  { %v460_v62 = vadd.f32 %v459_v60, %v453_v58  ;;  %v513_v63 = vadd.f32 %v512_v61, %v506_v59 }
 0x196   :  { %v461_v0 = vrot.slane %v460_v62, 4  ;;  %v514_v1 = vrot.slane %v513_v63, 4 }
 0x198   :  { %v462_v2 = vadd.f32 %v461_v0, %v460_v62  ;;  %v515_v3 = vadd.f32 %v514_v1, %v513_v63 }
 0x19a   :  { %v463_v4 = vrot.slane %v462_v2, 2  ;;  %v516_v5 = vrot.slane %v515_v3, 2 }
 0x19c   :  { %v464_v6 = vadd.f32 %v463_v4, %v462_v2  ;;  %v517_v7 = vadd.f32 %v516_v5, %v515_v3 }
 0x19e   :  { %v465_v8 = vrot.slane %v464_v6, 1  ;;  %v518_v9 = vrot.slane %v517_v7, 1 }
 0x1a0   :  { %v466_v10 = vadd.f32 %v465_v8, %v464_v6  ;;  %v519_v11 = vadd.f32 %v518_v9, %v517_v7 }
 0x1a2   :  { %v521_v13 = vsel %vm520_vm1, %v466_v10, %v519_v11 }
 0x1a3   :  { %v528_v14 = vadd.f32 %v526_v12, %v521_v13 }
 0x1a5   :  { %529 = vst [vmem:[#allocation2] sm:$0x3] %v528_v14 }
 0x1a6   :  { %644 = shalt.err (!%p641_p4)
}
 0x1a7   :  { %539 = dma.vmem_to_hbm [thread:$0]  %s537_s8, 32, %s880_s7, [#allocation3]  }
 0x1a8   :  { %653 = dma.done.wait [#allocation3], 32  }
 0x1a9   :  { %654 = vsyncadd [#allocation3], 4294967264 }
 0x1aa   :  { %543 = vsyncpa [#allocation3], 1 }

</bundles_post_ra>
